<compile_context>
chip_gen: v7x
topology: tpu7x:2x2x1
jax: 0.10.0
libtpu: 0.0.40
codegen_flags: <defaults>
</compile_context>

<pallas_src>
import jax
import jax.numpy as jnp
from jax.experimental import pallas as pl
from jax.experimental.pallas import tpu as pltpu


def _clip_points_linf_kernel(budget_ref, pc_ref, ori_ref, out_ref):
    # budget_ref: SMEM (1,) f32; pc/ori/out refs: (TB, 3, TS, 128) VMEM blocks.
    pc = pc_ref[...].astype(jnp.float32)
    ori = ori_ref[...].astype(jnp.float32)

    diff = pc - ori                                               # (TB,3,TS,128)
    sumsq = jnp.sum(diff * diff, axis=1, keepdims=True)           # (TB,1,TS,128)
    norm = jnp.sqrt(sumsq)                                        # per-point L2
    scale = jnp.minimum(budget_ref[0] / (norm + 1e-9), 1.0)       # clamp(max=1)
    out_ref[...] = (ori + diff * scale).astype(out_ref.dtype)


def _round_up(x, m):
    return ((x + m - 1) // m) * m


def _largest_divisor_leq(n, cap):
    cap = max(1, min(n, cap))
    for d in range(cap, 0, -1):
        if n % d == 0:
            return d
    return 1


def clip_points_linf(pc, ori_pc, budget, *, target_block_points=128 * 1024):
    """pc, ori_pc: [B, 3, K] float arrays -> clipped pc, same shape/dtype."""
    B, C, K = pc.shape
    assert C == 3 and ori_pc.shape == (B, C, K)

    # --- lane+sublane dense layout: [B,3,K] -> [B,3,S,128] -------------------
    # Pad K only to the next multiple of 128 (typical point clouds already
    # are); padded points have diff == 0 and are sliced off at the end.
    k128 = _round_up(K, 128)
    if k128 != K:
        pad = ((0, 0), (0, 0), (0, k128 - K))
        pc_p = jnp.pad(pc, pad)
        ori_p = jnp.pad(ori_pc, pad)
    else:
        pc_p, ori_p = pc, ori_pc
    S = k128 // 128
    pc_r = pc_p.reshape(B, C, S, 128)    # free view (row-major split)
    ori_r = ori_p.reshape(B, C, S, 128)

    # --- tile sizing ----------------------------------------------------------
    # Sublane-block count per tile: multiple of 8 (layout rule) capped so one
    # tile is ~target_block_points points (~9 MiB double-buffered VMEM in f32).
    ts_cap = max(8, ((target_block_points // 128) // 8) * 8)
    ts = S if S <= ts_cap else ts_cap            # ts == full S, or multiple of 8
    grid_s = pl.cdiv(S, ts)                      # ragged tail OK: pointwise op,
                                                 # OOB reads garbage / writes dropped
    # Fold batch into the block while a tile is still below target.
    tb = _largest_divisor_leq(B, max(1, target_block_points // (ts * 128)))
    grid_b = B // tb
    if grid_b * grid_s < 2 and B > 1:
        # Keep >=2 parallel grid steps so both v7x TensorCores get work.
        tb = _largest_divisor_leq(B, max(1, (B + 1) // 2))
        grid_b = B // tb

    tile_spec = pl.BlockSpec((tb, C, ts, 128), lambda b, s: (b, 0, s, 0))
    budget_spec = pl.BlockSpec(memory_space=pltpu.MemorySpace.SMEM)

    budget_arr = jnp.asarray(budget, dtype=jnp.float32).reshape((1,))

    out4 = pl.pallas_call(
        _clip_points_linf_kernel,
        out_shape=jax.ShapeDtypeStruct((B, C, S, 128), pc.dtype),
        grid_spec=pltpu.PrefetchScalarGridSpec(
            num_scalar_prefetch=0,
            grid=(grid_b, grid_s),
            in_specs=[budget_spec, tile_spec, tile_spec],
            out_specs=tile_spec,
        ),
        compiler_params=pltpu.CompilerParams(
            dimension_semantics=("parallel", "parallel")),
    )(budget_arr, pc_r, ori_r)

    out = out4.reshape(B, C, k128)
    if k128 != K:
        out = out[:, :, :K]
    return out


def _reference(pc, ori_pc, budget):
    # pure-JAX reference matching the PyTorch forward
    diff = pc - ori_pc
    norm = jnp.sqrt(jnp.sum(diff ** 2, axis=1))
    scale = jnp.minimum(budget / (norm + 1e-9), 1.0)
    return ori_pc + diff * scale[:, None, :]


if __name__ == "__main__":
    key = jax.random.PRNGKey(0)
    k_ori, k_noise = jax.random.split(key)

    B, K = 2, 200        # [B, 3, K] point clouds; K deliberately not a
    budget = 0.1         # multiple of 128 to exercise the lane padding path.

    ori_pc = jax.random.normal(k_ori, (B, 3, K), dtype=jnp.float32)
    pc = ori_pc + 0.3 * jax.random.normal(k_noise, (B, 3, K), dtype=jnp.float32)

    out = clip_points_linf(pc, ori_pc, budget)
    out = jax.block_until_ready(out)

    ref = _reference(pc, ori_pc, budget)
    assert out.shape == pc.shape, (out.shape, pc.shape)
    assert jnp.allclose(out, ref, atol=1e-5, rtol=1e-5), (
        float(jnp.max(jnp.abs(out - ref))))

    print("KERNEL_OK")
</pallas_src>

<mosaic_0001>
module attributes {stable_mosaic.version = 11 : i64} {
  func.func @_clip_points_linf_kernel(%arg0: i32, %arg1: i32, %arg2: memref<1xf32, #tpu.memory_space<smem>>, %arg3: memref<1x3x2x128xf32, #tpu.memory_space<vmem>>, %arg4: memref<1x3x2x128xf32, #tpu.memory_space<vmem>>, %arg5: memref<1x3x2x128xf32, #tpu.memory_space<vmem>>) attributes {dimension_semantics = [#tpu.dimension_semantics<parallel>, #tpu.dimension_semantics<parallel>], iteration_bounds = array<i64: 2, 1>, scalar_prefetch = 0 : i64, scratch_operands = 0 : i64, tpu.core_type = #tpu.core_type<tc>, window_params = [{transform_indices = @transform_0, window_bounds = array<i64: 1>}, {transform_indices = @transform_1, window_bounds = array<i64: 1, 3, 2, 128>}, {transform_indices = @transform_2, window_bounds = array<i64: 1, 3, 2, 128>}, {transform_indices = @transform_3, window_bounds = array<i64: 1, 3, 2, 128>}]} {
    %c0 = arith.constant 0 : index
    %c0_0 = arith.constant 0 : index
    %c0_1 = arith.constant 0 : index
    %c0_2 = arith.constant 0 : index
    %0 = vector.load %arg3[%c0, %c0_0, %c0_1, %c0_2] : memref<1x3x2x128xf32, #tpu.memory_space<vmem>>, vector<1x3x2x128xf32>
    %c0_3 = arith.constant 0 : index
    %c0_4 = arith.constant 0 : index
    %c0_5 = arith.constant 0 : index
    %c0_6 = arith.constant 0 : index
    %1 = vector.load %arg4[%c0_3, %c0_4, %c0_5, %c0_6] : memref<1x3x2x128xf32, #tpu.memory_space<vmem>>, vector<1x3x2x128xf32>
    %2 = arith.subf %0, %1 : vector<1x3x2x128xf32>
    %3 = arith.mulf %2, %2 : vector<1x3x2x128xf32>
    %cst = arith.constant dense<0.000000e+00> : vector<1x2x128xf32>
    %4 = vector.multi_reduction <add>, %3, %cst [1] : vector<1x3x2x128xf32> to vector<1x2x128xf32>
    %5 = vector.shape_cast %4 : vector<1x2x128xf32> to vector<1x1x2x128xf32>
    %6 = math.sqrt %5 : vector<1x1x2x128xf32>
    %c0_7 = arith.constant 0 : index
    %7 = memref.load %arg2[%c0_7] : memref<1xf32, #tpu.memory_space<smem>>
    %cst_8 = arith.constant 9.99999971E-10 : f32
    %8 = vector.broadcast %cst_8 : f32 to vector<1x1x2x128xf32>
    %9 = arith.addf %6, %8 : vector<1x1x2x128xf32>
    %10 = vector.broadcast %7 : f32 to vector<1x1x2x128xf32>
    %11 = arith.divf %10, %9 : vector<1x1x2x128xf32>
    %cst_9 = arith.constant 1.000000e+00 : f32
    %12 = vector.broadcast %cst_9 : f32 to vector<1x1x2x128xf32>
    %13 = arith.minimumf %11, %12 : vector<1x1x2x128xf32>
    %14 = vector.broadcast %13 : vector<1x1x2x128xf32> to vector<1x3x2x128xf32>
    %15 = arith.mulf %2, %14 : vector<1x3x2x128xf32>
    %16 = arith.addf %1, %15 : vector<1x3x2x128xf32>
    %c0_10 = arith.constant 0 : index
    %c0_11 = arith.constant 0 : index
    %c0_12 = arith.constant 0 : index
    %c0_13 = arith.constant 0 : index
    %17 = vector.load %arg5[%c0_10, %c0_11, %c0_12, %c0_13] : memref<1x3x2x128xf32, #tpu.memory_space<vmem>>, vector<1x3x2x128xf32>
    tpu.vector_store %arg5[%c0_10, %c0_11, %c0_12, %c0_13], %16 {strides = array<i32>} : memref<1x3x2x128xf32, #tpu.memory_space<vmem>>, vector<1x3x2x128xf32>,
    return
  }
  func.func @transform_0(%arg0: i32, %arg1: i32) -> i32 {
    %c0_i32 = arith.constant 0 : i32
    %c0_i32_0 = arith.constant 0 : i32
    return %c0_i32 : i32
  }
  func.func @transform_1(%arg0: i32, %arg1: i32) -> (i32, i32, i32, i32) {
    %c0_i32 = arith.constant 0 : i32
    %c0_i32_0 = arith.constant 0 : i32
    %c0_i32_1 = arith.constant 0 : i32
    return %arg0, %c0_i32, %arg1, %c0_i32_0 : i32, i32, i32, i32
  }
  func.func @transform_2(%arg0: i32, %arg1: i32) -> (i32, i32, i32, i32) {
    %c0_i32 = arith.constant 0 : i32
    %c0_i32_0 = arith.constant 0 : i32
    %c0_i32_1 = arith.constant 0 : i32
    return %arg0, %c0_i32, %arg1, %c0_i32_0 : i32, i32, i32, i32
  }
  func.func @transform_3(%arg0: i32, %arg1: i32) -> (i32, i32, i32, i32) {
    %c0_i32 = arith.constant 0 : i32
    %c0_i32_0 = arith.constant 0 : i32
    %c0_i32_1 = arith.constant 0 : i32
    return %arg0, %c0_i32, %arg1, %c0_i32_0 : i32, i32, i32, i32
  }
}

</mosaic_0001>

<bundles_post_ra>
// kernel: tpu_custom_call.1
= control target key start
LH: loop header
LB: loop body
LE: loop exit
PB: predicated region body
PF: predicated region fallthrough
CT: control target
= control target key end

     0   :  { %s925_s0 = inlined_call_operand.<no memory space> [shape: f32[1], index: 0, kind: input, shape index: {}]   ;;  %s926_s1 = inlined_call_operand.hbm [shape: f32[2,3,2,128], index: 1, kind: input, shape index: {}]   ;;  %s927_s2 = inlined_call_operand.hbm [shape: f32[2,3,2,128], index: 2, kind: input, shape index: {}]   ;;  %s928_s3 = inlined_call_operand.hbm [shape: f32[2,3,2,128], index: 3, kind: output, shape index: {}]  }
   0x1   :  { %8 = sst [smem:[#allocation2]] %s925_s0 }
   0x2   :  { %9 = vsyncpa [#allocation4], 0 }
   0x3   :  { %11 = vsyncpa [#allocation4 + $0x1], 0 }
   0x4   :  { %12 = vsyncpa [#allocation7], 0 }
   0x5   :  { %14 = vsyncpa [#allocation7 + $0x1], 0 }
   0x6   :  { %15 = vsyncpa [#allocation5], 0 }
   0x7   :  { %17 = vsyncpa [#allocation5 + $0x1], 0  ;;  %s684_s14 = smov 0   ;;  %s686_s15 = smov 0  }
   0x8   :  { %s688_s16 = smov 0   ;;  %s690_s17 = smov 0  }
   0x9   :  { %s692_s18 = smov 0   ;;  %s694_s19 = smov 0  }
   0xa LB: > { %s415_s0 = sadd.s32 4294967295, %s652_s19   ;;  %s416_s20 = sadd.s32 4294967294, %s652_s19   ;;  %s652_s19 = sphi %s694_s19, %s23_s19   ;;  %s648_s18 = sphi %s692_s18, %s946_s18   ;;  %s644_s17 = sphi %s690_s17, %s945_s17   ;;  %s640_s16 = sphi %s688_s16, %s944_s16   ;;  %s636_s15 = sphi %s686_s15, %s943_s15   ;;  %s632_s14 = sphi %s684_s14, %s942_s14  }
   0xb   : > { %s35_s21 = sadd.s32 1, %s648_s18  ;;  %s65_s22 = sadd.s32 1, %s640_s16 }
   0xc   : > { %p37_p0 = scmp.ge.s32.totalorder %s35_s21, 2  ;;  %p72_p1 = scmp.ne.s32.totalorder %s640_s16, %s636_s15 }
   0xd   : > { %p73_p2 = scmp.eq.s32.totalorder %s652_s19, 0  ;;  %p78_p3 = scmp.ne.s32.totalorder %s636_s15, %s632_s14 }
   0xe   : > { %s948_s21 = smov (%p37_p0, %s35_s21), 0  ;;  %p79_p5 = scmp.eq.s32.totalorder %s415_s0, 0 }
   0xf   : > { %p725_p4 = por %p73_p2, %p72_p1  ;;  %s60_s24 = ssub.s32 %s648_s18, %s948_s21 }
  0x10   : > { %p132_p6 = scmp.eq.s32.totalorder %s415_s0, 1  ;;  %p63_p7 = scmp.eq.s32.totalorder %s60_s24, 0 }
  0x11   : > { %p731_p8 = por %p79_p5, %p78_p3  ;;  %p138_p10 = scmp.eq.s32.totalorder %s416_s20, 1 }
  0x12   : > { %p735_p9 = por %p132_p6, %p72_p1  ;;  %p448_p13 = scmp.lt.s32.totalorder %s652_s19, 2 }
  0x13   : > { %s932_s25 = scalar_select %p731_p8, 1, 0 }
  0x14   : > { %s933_s26 = scalar_select %p735_p9, 1, 0 }
  0x15   : > { %s740_s27 = scalar_select %p63_p7, %s640_s16, %s65_s22  }
  0x16   : > { %p742_p11 = por %p138_p10, %p78_p3  ;;  %s749_s29 = sand.u32 1, %s640_s16  }
  0x17   : > { %s425_s30 = smul.u32 6, %s749_s29  ;;  %p755_p0 = pnand %p448_p13, %p725_p4 }
  0x18   : > { %s934_s28 = scalar_select %p742_p11, 1, 0 }
  0x19   : > { %s426_s4 = smul.u32 96, %s648_s18  ;;  %s165_s9 = scalar_lea.vmem [#allocation3], %s425_s30 }
  0x1a   : > { %s173_s10 = sshll.u32 %s165_s9, 4  ;;  %s162_s11 = scalar_lea.sflag [#allocation4], %s749_s29  ;;  %s768_s10 = int_to_ptr.vmem [resolvable:$true] %s173_s10 }
  0x1b   : > { %s764_s8 = scalar_lea.hbm %s926_s1, %s426_s4  ;;  %p508_p3 = pneg %p755_p0 }
  0x1c   : > { %s506_s12 = scalar_lea.hbm %s764_s8, 96  ;;  %s511_s20 = scalar_lea.hbm %s926_s1, 192 }
  0x1d   : > { %p507_p2 = scmp.ne.s32.totalorder %s764_s8, %s506_s12  ;;  %p512_p6 = scmp.lt.u32.totalorder %s764_s8, %s926_s1 }
  0x1e   : > { %p513_p7 = scmp.lt.u32.totalorder %s511_s20, %s506_s12  ;;  %p515_p13 = scmp.lt.u32.totalorder %s506_s12, %s764_s8 }
  0x1f   : > { %p509_p4 = pnand %p508_p3, %p507_p2 }
  0x20   : > { %p514_p10 = por %p513_p7, %p512_p6 }
  0x21   : > { %p510_p5 = pneg %p509_p4 }
  0x22   : > { %p516_p12 = por %p515_p13, %p514_p10 }
  0x24   : > { %p517_p1 = pnand %p516_p12, %p510_p5 }
  0x26   : > { %520 = shalt.err (!%p517_p1)
}
  0x27   : > { %s521_s24 = scalar_lea.vmem %s768_s10, 96  ;;  %s654_s6 = smov [#allocation3]  }
  0x28   : > { %p522_p2 = scmp.ne.s32.totalorder %s768_s10, %s521_s24  ;;  %s526_s7 = sshll.u32 %s654_s6, 4  ;;  %s527_s7 = int_to_ptr.vmem [resolvable:$false] %s526_s7 }
  0x29   : > { %s528_s9 = scalar_lea.vmem %s527_s7, 192  ;;  %p529_p9 = scmp.lt.s32.totalorder %s768_s10, %s527_s7 }
  0x2a   : > { %p524_p4 = pnand %p522_p2, %p508_p3  ;;  %p530_p6 = scmp.lt.s32.totalorder %s528_s9, %s521_s24 }
  0x2c   : > { %p525_p11 = pneg %p524_p4  ;;  %p531_p7 = por %p530_p6, %p529_p9 }
  0x2e   : > { %p532_p10 = pnand %p531_p7, %p525_p11 }
  0x30   : > { %535 = shalt.err (!%p532_p10)
}
  0x31   : > { %s655_s12 = smov 32   ;;  %s656_s13 = smov 2  }
  0x32   : > { %440 = dma.hbm_to_vmem [thread:$0]  (!%p755_p0), %s764_s8, 96, %s768_s10, %s162_s11, %s655_s12, %s655_s12, %s656_s13  }
  0x33   : > { %p203_p9 = scmp.lt.s32.totalorder %s652_s19, 3  ;;  %s808_s22 = scalar_lea.hbm %s927_s2, %s426_s4 }
  0x34   : > { %p936_p11 = scmp.ge.s32.totalorder %s652_s19, 1  ;;  %s187_s24 = scalar_lea.vmem [#allocation6], %s425_s30 }
  0x35   : > { %s195_s6 = sshll.u32 %s187_s24, 4  ;;  %s184_s8 = scalar_lea.sflag [#allocation7], %s749_s29  ;;  %s818_s6 = int_to_ptr.vmem [resolvable:$true] %s195_s6 }
  0x36   : > { %p812_p12 = pnand %p936_p11, %p203_p9  ;;  %s536_s10 = scalar_lea.hbm %s808_s22, 96 }
  0x37   : > { %p537_p1 = scmp.ne.s32.totalorder %s808_s22, %s536_s10  ;;  %s541_s7 = scalar_lea.hbm %s927_s2, 192 }
  0x38   : > { %p542_p2 = scmp.lt.u32.totalorder %s808_s22, %s927_s2  ;;  %p543_p4 = scmp.lt.u32.totalorder %s541_s7, %s536_s10 }
  0x39   : > { %p539_p5 = pnand %p537_p1, %p508_p3  ;;  %p545_p7 = scmp.lt.u32.totalorder %s536_s10, %s808_s22 }
  0x3a   : > { %p544_p6 = por %p543_p4, %p542_p2 }
  0x3b   : > { %p540_p13 = pneg %p539_p5 }
  0x3c   : > { %p546_p10 = por %p545_p7, %p544_p6 }
  0x3e   : > { %p547_p9 = pnand %p546_p10, %p540_p13 }
  0x40   : > { %550 = shalt.err (!%p547_p9)
}
  0x41   : > { %s551_s30 = scalar_lea.vmem %s818_s6, 96  ;;  %s657_s20 = smov [#allocation6]  }
  0x42   : > { %p552_p11 = scmp.ne.s32.totalorder %s818_s6, %s551_s30  ;;  %s556_s24 = sshll.u32 %s657_s20, 4  ;;  %s557_s24 = int_to_ptr.vmem [resolvable:$false] %s556_s24 }
  0x43   : > { %s558_s4 = scalar_lea.vmem %s557_s24, 192  ;;  %p559_p8 = scmp.lt.s32.totalorder %s818_s6, %s557_s24 }
  0x44   : > { %p554_p1 = pnand %p552_p11, %p508_p3  ;;  %p560_p2 = scmp.lt.s32.totalorder %s558_s4, %s551_s30 }
  0x46   : > { %p555_p5 = pneg %p554_p1  ;;  %p561_p4 = por %p560_p2, %p559_p8 }
  0x48   : > { %p562_p6 = pnand %p561_p4, %p555_p5 }
  0x4a   : > { %565 = shalt.err (!%p562_p6)
}
  0x4b   : > { %443 = dma.hbm_to_vmem [thread:$0]  (!%p755_p0), %s808_s22, 96, %s818_s6, %s184_s8, %s655_s12, %s655_s12, %s656_s13  }
  0x4c   : > { %207 = sbr.rel (%p812_p12) target bundleno = 149 (0x95), region = 32  ;;  %s852_s10 = sand.u32 (!%p812_p12), 1, %s636_s15  }
  0x4d   : > { %s855_s11 = smul.u32 (!%p812_p12), 6, %s852_s10  ;;  %s210_s5 = scalar_lea.sflag (!%p812_p12), [#allocation4], %s852_s10 }
  0x4e   : > { %p938_p8 = scmp.ne.s32.totalorder (!%p812_p12), %s932_s25, 0 }
  0x4f   : > { %s213_s7 = scalar_lea.vmem (!%p812_p12), [#allocation3], %s855_s11 }
  0x53   : > { %619 = dma.done.wait (%p938_p8), %s210_s5, 96  }
  0x54   : > { %621 = vsyncadd (%p938_p8), %s210_s5, 4294967200  ;;  %s219_s29 = scalar_lea.sflag [#allocation7], %s852_s10  ;;  %s222_s12 = scalar_lea.vmem [#allocation6], %s855_s11 }
  0x55   : > { %623 = dma.done.wait (%p938_p8), %s219_s29, 96  }
  0x56   : > { %625 = vsyncadd (%p938_p8), %s219_s29, 4294967200  ;;  %v250_v0 = vld [vmem:[%s213_s7] sm:$0x3]  ;;  %v251_v1 = vld [vmem:[%s213_s7 + $0x2] sm:$0x3]  ;;  %vm262_vm0 = vcmask 1041408  }
  0x57   : > { %v252_v2 = vld [vmem:[%s213_s7 + $0x4] sm:$0x3]  ;;  %v253_v3 = vld [vmem:[%s222_s12] sm:$0x3]  ;;  %v254_v4 = vld [vmem:[%s222_s12 + $0x2] sm:$0x3] }
  0x58   : > { %v255_v5 = vld [vmem:[%s222_s12 + $0x4] sm:$0x3]  ;;  %v256_v6 = vsub.f32 %v250_v0, %v253_v3  ;;  %v257_v7 = vsub.f32 %v251_v1, %v254_v4  ;;  %s275_s25 = sld [smem:[#allocation2]]  ;;  %s249_s13 = scalar_lea.vmem [#allocation8], %s855_s11 }
  0x59   : > { %v258_v8 = vsub.f32 %v252_v2, %v255_v5  ;;  %s305_s22 = sshll.u32 %s249_s13, 4  ;;  %s430_s23 = smul.u32 96, %s644_s17  ;;  %s871_s22 = int_to_ptr.vmem [resolvable:$true] %s305_s22 }
  0x5a   : > { %v259_v9 = vmul.f32 %v256_v6, %v256_v6  ;;  %v260_v10 = vmul.f32 %v257_v7, %v257_v7  ;;  %s291_s17 = scalar_lea.sflag [#allocation5], %s852_s10  ;;  %s566_s0 = scalar_lea.vmem %s871_s22, 96 }
  0x5b   : > { %v261_v11 = vmul.f32 %v258_v8, %v258_v8  ;;  %s876_s9 = scalar_lea.hbm %s928_s3, %s430_s23  ;;  %p567_p0 = scmp.ne.s32.totalorder %s871_s22, %s566_s0 }
  0x5c   : > { %v263_v12 = vsel %vm262_vm0, %v259_v9, 0.0  ;;  %v264_v13 = vsel %vm262_vm0, %v260_v10, 0.0  ;;  %p939_p3 = scmp.ne.s32.totalorder %s933_s26, 0  ;;  %s658_s30 = smov [#allocation8]  }
  0x5d   : > { %v266_v14 = vsel %vm262_vm0, %v261_v11, 0.0  ;;  %v265_v15 = vadd.f32 %v264_v13, %v263_v12  ;;  %s570_s20 = sshll.u32 %s658_s30, 4  ;;  %s571_s20 = int_to_ptr.vmem [resolvable:$false] %s570_s20 }
  0x5e   : > { %v277_v23 = vstv %s275_s25  ;;  %p568_p12 = pnand %p567_p0, %p939_p3  ;;  %s572_s24 = scalar_lea.vmem %s571_s20, 192 }
  0x5f   : > { %v267_v16 = vadd.f32 %v266_v14, %v265_v15  ;;  %p573_p7 = scmp.lt.s32.totalorder %s871_s22, %s571_s20  ;;  %p574_p10 = scmp.lt.s32.totalorder %s572_s24, %s566_s0 }
  0x60   : > { %p569_p13 = pneg %p568_p12 }
  0x61   : > { %502 = vrsqrt.f32 %v267_v16  ;;  %vm270_vm1 = vcmp.eq.f32.partialorder %v267_v16, inf  ;;  %v273_v18 = vand.u32 2147483648, %v267_v16  ;;  %vm272_vm2 = vcmp.eq.f32.partialorder %v267_v16, 0.0  ;;  %p575_p9 = por %p574_p10, %p573_p7 }
  0x63   : > { %p576_p11 = pnand %p575_p9, %p569_p13 }
  0x6b   : > { %v503_v17 = vpop.eup %502 }
  0x6c   : > { %v269_v19 = vmul.f32 %v503_v17, %v267_v16 }
  0x6e   : > { %v271_v20 = vsel %vm270_vm1, %v267_v16, %v269_v19 }
  0x6f   : > { %v274_v21 = vsel %vm272_vm2, %v273_v18, %v271_v20 }
  0x70   : > { %v276_v22 = vadd.f32 1e-09, %v274_v21 }
  0x72   : > { %504 = vrcp.f32 %v276_v22 }
  0x7c   : > { %v505_v24 = vpop.eup %504 }
  0x7d   : > { %v279_v25 = vmul.f32 %v505_v24, %v277_v23 }
  0x7f   : > { %v280_v26 = vmin.f32 %v279_v25, 1.0 }
  0x81   : > { %v281_v27 = vmul.f32 %v280_v26, %v256_v6  ;;  %v282_v28 = vmul.f32 %v280_v26, %v257_v7  ;;  %v283_v29 = vmul.f32 %v280_v26, %v258_v8 }
  0x83   : > { %v284_v30 = vadd.f32 %v281_v27, %v253_v3  ;;  %v285_v31 = vadd.f32 %v282_v28, %v254_v4  ;;  %v286_v32 = vadd.f32 %v283_v29, %v255_v5 }
  0x85   : > { %287 = vst [vmem:[%s249_s13] sm:$0x3] %v284_v30  ;;  %288 = vst [vmem:[%s249_s13 + $0x2] sm:$0x3] %v285_v31 }
  0x86   : > { %289 = vst [vmem:[%s249_s13 + $0x4] sm:$0x3] %v286_v32 }
  0x87   : > { %579 = shalt.err (!%p576_p11)
}
  0x88   : > { %s580_s4 = scalar_lea.hbm %s876_s9, 96  ;;  %s584_s7 = scalar_lea.hbm %s928_s3, 192 }
  0x89   : > { %p581_p1 = scmp.ne.s32.totalorder %s876_s9, %s580_s4  ;;  %p585_p4 = scmp.lt.u32.totalorder %s876_s9, %s928_s3 }
  0x8a   : > { %p586_p6 = scmp.lt.u32.totalorder %s584_s7, %s580_s4  ;;  %p588_p0 = scmp.lt.u32.totalorder %s580_s4, %s876_s9 }
  0x8b   : > { %p582_p5 = pnand %p581_p1, %p939_p3 }
  0x8c   : > { %p587_p8 = por %p586_p6, %p585_p4 }
  0x8d   : > { %p583_p2 = pneg %p582_p5 }
  0x8e   : > { %p589_p12 = por %p588_p0, %p587_p8 }
  0x90   : > { %p590_p13 = pnand %p589_p12, %p583_p2 }
  0x92   : > { %593 = shalt.err (!%p590_p13)
}
  0x93   : > { %s659_s25 = smov 32   ;;  %s660_s13 = smov 2  }
  0x94   : > { %435 = dma.vmem_to_hbm [thread:$0]  (%p939_p3), %s871_s22, 96, %s876_s9, %s291_s17, %s659_s25, %s659_s25, %s660_s13  }
  0x95 PF: > { %s320_s23 = sand.u32 1, %s632_s14   ;;  %p940_p7 = scmp.ne.s32.totalorder %s934_s28, 0 }
  0x96   : > { %p941_p10 = scmp.ge.s32.totalorder %s652_s19, 2  ;;  %s321_s6 = scalar_lea.sflag [#allocation5], %s320_s23 }
  0x98   : > { %p445_p9 = pnand %p941_p10, %p940_p7 }
  0x9a   : > { %627 = dma.done.wait (!%p445_p9), %s321_s6, 96  }
  0x9b   : > { %629 = vsyncadd (!%p445_p9), %s321_s6, 4294967200  ;;  %s23_s19 = sadd.s32 1, %s652_s19   ;;  %s942_s14 = smov %s636_s15 }
  0x9c   : > { %p20_p11 = scmp.ge.s32.totalorder %s23_s19, 4   ;;  %s943_s15 = smov %s640_s16 }
  0x9d   : > { %s944_s16 = smov %s740_s27  ;;  %s945_s17 = smov %s648_s18 }
  0x9e   : > { %s946_s18 = smov %s948_s21  ;;  %22 = sbr.rel (!%p20_p11) target bundleno = 10 (0xa), region = 90 }
  0xa5   :  { %326 = vsyncpa [#allocation4], 1 }
  0xa6   :  { %328 = vsyncpa [#allocation4 + $0x1], 1 }
  0xa7   :  { %329 = vsyncpa [#allocation7], 1 }
  0xa8   :  { %331 = vsyncpa [#allocation7 + $0x1], 1 }
  0xa9   :  { %332 = vsyncpa [#allocation5], 1 }
  0xaa   :  { %334 = vsyncpa [#allocation5 + $0x1], 1 }

</bundles_post_ra>
